<compile_context>
chip_gen: v7x
topology: tpu7x:2x2x1
jax: 0.10.0
libtpu: 0.0.40
codegen_flags: <defaults>
</compile_context>

<pallas_src>
import jax
import jax.numpy as jnp
from jax import lax
from jax.experimental import pallas as pl
from jax.experimental.pallas import tpu as pltpu


def _round_up(x, m):
    return (x + m - 1) // m * m


def _tpu_generation():
    """Best-effort TPU generation (5, 6, 7, ...); None if unknown."""
    try:
        kind = jax.devices()[0].device_kind.lower().replace(" ", "")
    except Exception:
        return None
    for gen in (7, 6, 5, 4, 3):
        if ("v%d" % gen) in kind or ("tpu%d" % gen) in kind:
            return gen
    return None


def _make_grn_kernel(hp, d, eps, exp_dtype, matmul_dtype, exact):
    """hp: padded hidden width (lane-aligned split point); d: true feature dim."""
    inv_d = 1.0 / d

    def kernel(x_ref, w1g_ref, b1g_ref, w2_ref, b2_ref, gamma_ref, beta_ref,
               o_ref):
        x = x_ref[...]
        x_f32 = x.astype(jnp.float32)

        # Fused fc1 | gate matmul: one MXU pass over the shared LHS x.
        hg = jnp.dot(x, w1g_ref[...],
                     preferred_element_type=jnp.float32) + b1g_ref[...]
        h_lin = hg[:, :hp]       # fc1 pre-activation (cols H..Hp are exactly 0)
        g_lin = hg[:, hp:]       # gate pre-activation (real D columns)

        # ELU(alpha=1). Dropout is identity at inference.  exp arg clamped <= 0
        # so the unselected branch never overflows; exp in bf16 on v6e/v7x.
        e = jnp.exp(jnp.minimum(h_lin, 0.0).astype(exp_dtype)).astype(jnp.float32)
        h = jnp.where(h_lin > 0.0, h_lin, e - 1.0)

        # fc2 (padded w2 rows are zero, so padded h columns contribute nothing).
        out = jnp.dot(h.astype(matmul_dtype), w2_ref[...],
                      preferred_element_type=jnp.float32) + b2_ref[...]

        # sigmoid(gate(x)): exp on the EUP; approx reciprocal is also EUP (vrcp)
        # and co-issues for free.  Exact path keeps approx=False.
        eg = jnp.exp((-g_lin).astype(exp_dtype)).astype(jnp.float32)
        g = pl.reciprocal(1.0 + eg, approx=not exact)

        # Gated residual combine.
        y = g * out + (1.0 - g) * x_f32

        # LayerNorm over the (unpadded) feature axis: no iota / masks needed.
        mean = jnp.sum(y, axis=-1, keepdims=True) * inv_d
        centered = y - mean
        var = jnp.sum(centered * centered, axis=-1, keepdims=True) * inv_d
        y_norm = centered * lax.rsqrt(var + eps)
        o_ref[...] = (y_norm * gamma_ref[...] + beta_ref[...]).astype(o_ref.dtype)

    return kernel


def prepare_grn_params(w1, b1, w2, b2, wg, bg, gamma, beta, *,
                       matmul_dtype=jnp.bfloat16):
    """One-time parameter prep (do this ONCE and reuse across calls).

    Fuses fc1|gate into a single (D, Hp+D) weight, zero-pads the hidden dim to
    a lane-aligned split point Hp, and casts matmul weights to matmul_dtype.
    Weights are in (in, out) layout; biases may be (dim,) or (1, dim).
    """
    f32 = jnp.float32
    D, H = w1.shape
    Hp = _round_up(H, 128)

    w1g = jnp.zeros((D, Hp + D), f32)
    w1g = w1g.at[:, :H].set(w1.astype(f32)).at[:, Hp:].set(wg.astype(f32))
    b1g = jnp.zeros((1, Hp + D), f32)
    b1g = b1g.at[:, :H].set(b1.reshape(1, -1).astype(f32))
    b1g = b1g.at[:, Hp:].set(bg.reshape(1, -1).astype(f32))
    w2p = jnp.zeros((Hp, D), f32).at[:H, :].set(w2.astype(f32))

    return dict(
        w1g=w1g.astype(matmul_dtype),
        b1g=b1g,
        w2=w2p.astype(matmul_dtype),
        b2=b2.reshape(1, -1).astype(f32),
        gamma=gamma.reshape(1, -1).astype(f32),
        beta=beta.reshape(1, -1).astype(f32),
        hp=Hp, d=D, h=H, matmul_dtype=matmul_dtype,
    )


def grn_block_apply(x, params, *, block_b=None, eps=1e-5):
    """x: (B, D) f32 (or bf16); params: output of prepare_grn_params."""
    B, D = x.shape
    assert D == params["d"], "feature dim mismatch with prepared params"
    Hp = params["hp"]
    matmul_dtype = params["matmul_dtype"]
    exact = matmul_dtype == jnp.float32

    gen = _tpu_generation()
    num_tc = 2 if gen == 7 else 1                     # TensorCores per chip
    phys_vmem = (64 if gen == 7 else 128) * 1024 * 1024
    vmem_cap = (48 if gen == 7 else 100) * 1024 * 1024
    # bf16 transcendentals only where the EUP supports bf16 (v6e / v7x).
    exp_dtype = jnp.bfloat16 if (gen in (6, 7) and not exact) else jnp.float32

    # Feed x in the matmul dtype on the fast path (halves x HBM traffic).
    x_in = x if exact else x.astype(matmul_dtype)
    x_item = jnp.dtype(x_in.dtype).itemsize

    w_item = jnp.dtype(matmul_dtype).itemsize
    w_bytes = (params["w1g"].size + params["w2"].size) * w_item
    small_bytes = 4 * (params["b1g"].size + params["b2"].size
                       + params["gamma"].size + params["beta"].size)

    def vmem_est(bb):
        tiles = 2 * bb * D * (x_item + 4)            # double-buffered x / out tiles
        tmps = 4 * bb * (2 * (Hp + D) + 5 * D)       # f32 intermediates
        return 2 * (w_bytes + small_bytes) + tiles + tmps

    if block_b is None:
        block_b = min(512, _round_up(max(B, 1), 8))
        # v7x: keep >= ~2 grid steps per TensorCore when the batch allows it;
        # single-TC chips (v5e/v6e) keep the largest tile (splitting is overhead).
        if num_tc >= 2 and B >= 4 * 128:
            block_b = min(block_b, _round_up(pl.cdiv(B, 4), 8))
        # Shrink the tile if the estimate would crowd physical VMEM.
        while block_b > 64 and vmem_est(block_b) > 0.45 * phys_vmem:
            block_b = max(64, _round_up(block_b // 2, 8))

    grid = (pl.cdiv(B, block_b),)
    vmem_limit = int(min(vmem_cap, max(32 * 1024 * 1024, 2 * vmem_est(block_b))))

    flops = 2 * B * (D * (Hp + D) + Hp * D)
    transcendentals = B * (Hp + D)
    bytes_accessed = B * D * (x_item + 4) + w_bytes + small_bytes

    full = lambda shape: pl.BlockSpec(shape, lambda i: (0,) * len(shape))
    kernel = _make_grn_kernel(Hp, D, eps, exp_dtype, matmul_dtype, exact)

    out = pl.pallas_call(
        kernel,
        out_shape=jax.ShapeDtypeStruct((B, D), jnp.float32),
        grid_spec=pltpu.PrefetchScalarGridSpec(
            num_scalar_prefetch=0,
            grid=grid,
            in_specs=[
                pl.BlockSpec((block_b, D), lambda i: (i, 0)),  # x tile
                full((D, Hp + D)),    # fused fc1|gate weight
                full((1, Hp + D)),    # fused fc1|gate bias
                full((Hp, D)),        # fc2 weight (rows H..Hp are zero)
                full((1, D)),         # fc2 bias
                full((1, D)),         # LayerNorm gamma
                full((1, D)),         # LayerNorm beta
            ],
            out_specs=pl.BlockSpec((block_b, D), lambda i: (i, 0)),
        ),
        compiler_params=pltpu.CompilerParams(
            dimension_semantics=("parallel",),
            vmem_limit_bytes=vmem_limit),
        cost_estimate=pl.CostEstimate(flops=flops,
                                      transcendentals=transcendentals,
                                      bytes_accessed=bytes_accessed),
    )(x_in, params["w1g"], params["b1g"], params["w2"], params["b2"],
      params["gamma"], params["beta"])
    return out


def init_params(key, input_dim, hidden_dim):
    """Deterministic init mimicking torch.nn.Linear defaults, (in, out) layout."""
    ks = jax.random.split(key, 6)

    def linear(kw, kb, fan_in, fan_out):
        bound = 1.0 / jnp.sqrt(fan_in)
        w = jax.random.uniform(kw, (fan_in, fan_out), jnp.float32, -bound, bound)
        b = jax.random.uniform(kb, (1, fan_out), jnp.float32, -bound, bound)
        return w, b

    w1, b1 = linear(ks[0], ks[1], input_dim, hidden_dim)   # fc1
    w2, b2 = linear(ks[2], ks[3], hidden_dim, input_dim)   # fc2
    wg, bg = linear(ks[4], ks[5], input_dim, input_dim)    # gate
    gamma = jnp.ones((1, input_dim), jnp.float32)          # LayerNorm weight
    beta = jnp.zeros((1, input_dim), jnp.float32)          # LayerNorm bias
    return w1, b1, w2, b2, wg, bg, gamma, beta


def grn_block_ref(x, w1, b1, w2, b2, wg, bg, gamma, beta, eps=1e-5):
    """Pure-JAX f32 reference for correctness checking."""
    h = x @ w1 + b1
    h = jnp.where(h > 0, h, jnp.exp(jnp.minimum(h, 0.0)) - 1.0)
    out = h @ w2 + b2
    g = jax.nn.sigmoid(x @ wg + bg)
    y = g * out + (1 - g) * x
    mean = jnp.mean(y, axis=-1, keepdims=True)
    var = jnp.mean((y - mean) ** 2, axis=-1, keepdims=True)
    return (y - mean) / jnp.sqrt(var + eps) * gamma + beta


if __name__ == "__main__":
    key = jax.random.PRNGKey(0)
    k_x, k_p, k_x2 = jax.random.split(key, 3)

    B, D, H = 128, 32, 64  # batch, input_dim, hidden_dim (small test shapes)
    x = jax.random.normal(k_x, (B, D), jnp.float32)
    raw = init_params(k_p, D, H)
    ref = grn_block_ref(x, *raw)

    # Exactness check: f32 weights + f32 x, exact reciprocal, f32 exp.
    params_f32 = prepare_grn_params(*raw, matmul_dtype=jnp.float32)
    out_f32 = jax.block_until_ready(grn_block_apply(x, params_f32))
    assert out_f32.shape == (B, D)
    assert jnp.allclose(out_f32, ref, atol=5e-4, rtol=5e-4), \
        "f32 path mismatch vs reference"

    # Fast path: bf16 weights + bf16 x on the MXU, f32 accumulation/LayerNorm,
    # approx reciprocal and (on v6e/v7x) bf16 EUP exp.
    params_bf16 = prepare_grn_params(*raw, matmul_dtype=jnp.bfloat16)
    out_bf = jax.block_until_ready(grn_block_apply(x, params_bf16))
    assert out_bf.shape == (B, D)
    assert jnp.allclose(out_bf, ref, atol=1e-1, rtol=1e-1), \
        "bf16 path mismatch vs reference"

    # No-batch-pad path: cdiv grid with a partial last block (B not a multiple
    # of block_b); out-of-range rows are don't-care and never written back.
    B2 = 200
    x2 = jax.random.normal(k_x2, (B2, D), jnp.float32)
    ref2 = grn_block_ref(x2, *raw)
    out2 = jax.block_until_ready(grn_block_apply(x2, params_bf16, block_b=128))
    assert out2.shape == (B2, D)
    assert jnp.allclose(out2, ref2, atol=1e-1, rtol=1e-1), \
        "partial-last-block mismatch vs reference"

    # TODO(synk): dropout after ELU is identity at inference and is omitted;
    # training-mode dropout would need pltpu.prng_seed / prng_random_bits.
    print("KERNEL_OK")
</pallas_src>

<mosaic_0001>
module attributes {stable_mosaic.version = 11 : i64} {
  func.func @kernel(%arg0: i32, %arg1: memref<128x32xf32, #tpu.memory_space<vmem>>, %arg2: memref<32x160xf32, #tpu.memory_space<vmem>>, %arg3: memref<1x160xf32, #tpu.memory_space<vmem>>, %arg4: memref<128x32xf32, #tpu.memory_space<vmem>>, %arg5: memref<1x32xf32, #tpu.memory_space<vmem>>, %arg6: memref<1x32xf32, #tpu.memory_space<vmem>>, %arg7: memref<1x32xf32, #tpu.memory_space<vmem>>, %arg8: memref<128x32xf32, #tpu.memory_space<vmem>>) attributes {dimension_semantics = [#tpu.dimension_semantics<parallel>], iteration_bounds = array<i64: 1>, scalar_prefetch = 0 : i64, scratch_operands = 0 : i64, tpu.core_type = #tpu.core_type<tc>, window_params = [{transform_indices = @transform_0, window_bounds = array<i64: 128, 32>}, {pipeline_mode = #tpu.pipeline_mode<synchronous>, transform_indices = @transform_1, window_bounds = array<i64: 32, 160>}, {pipeline_mode = #tpu.pipeline_mode<synchronous>, transform_indices = @transform_2, window_bounds = array<i64: 1, 160>}, {pipeline_mode = #tpu.pipeline_mode<synchronous>, transform_indices = @transform_3, window_bounds = array<i64: 128, 32>}, {pipeline_mode = #tpu.pipeline_mode<synchronous>, transform_indices = @transform_4, window_bounds = array<i64: 1, 32>}, {pipeline_mode = #tpu.pipeline_mode<synchronous>, transform_indices = @transform_5, window_bounds = array<i64: 1, 32>}, {pipeline_mode = #tpu.pipeline_mode<synchronous>, transform_indices = @transform_6, window_bounds = array<i64: 1, 32>}, {transform_indices = @transform_7, window_bounds = array<i64: 128, 32>}]} {
    %c0 = arith.constant 0 : index
    %c0_0 = arith.constant 0 : index
    %0 = vector.load %arg1[%c0, %c0_0] : memref<128x32xf32, #tpu.memory_space<vmem>>, vector<128x32xf32>
    %c0_1 = arith.constant 0 : index
    %c0_2 = arith.constant 0 : index
    %1 = vector.load %arg2[%c0_1, %c0_2] : memref<32x160xf32, #tpu.memory_space<vmem>>, vector<32x160xf32>
    %cst = arith.constant dense<0.000000e+00> : vector<128x160xf32>
    %2 = tpu.matmul %0, %1, %cst {dimension_numbers = #tpu.dot_dimension_numbers<[1], [0], [0], [1], [0, 0, 1, 1], [], []>} : vector<128x32xf32>, vector<32x160xf32>, vector<128x160xf32> -> vector<128x160xf32>
    %c0_3 = arith.constant 0 : index
    %c0_4 = arith.constant 0 : index
    %3 = vector.load %arg3[%c0_3, %c0_4] : memref<1x160xf32, #tpu.memory_space<vmem>>, vector<1x160xf32>
    %4 = vector.broadcast %3 : vector<1x160xf32> to vector<128x160xf32>
    %5 = arith.addf %2, %4 : vector<128x160xf32>
    %6 = vector.extract_strided_slice %5 {offsets = [0, 0], sizes = [128, 128], strides = [1, 1]} : vector<128x160xf32> to vector<128x128xf32>
    %7 = vector.extract_strided_slice %5 {offsets = [0, 128], sizes = [128, 32], strides = [1, 1]} : vector<128x160xf32> to vector<128x32xf32>
    %cst_5 = arith.constant 0.000000e+00 : f32
    %8 = vector.broadcast %cst_5 : f32 to vector<128x128xf32>
    %9 = arith.minimumf %6, %8 : vector<128x128xf32>
    %10 = math.exp %9 : vector<128x128xf32>
    %cst_6 = arith.constant 0.000000e+00 : f32
    %11 = vector.broadcast %cst_6 : f32 to vector<128x128xf32>
    %12 = arith.cmpf ogt, %6, %11 : vector<128x128xf32>
    %cst_7 = arith.constant 1.000000e+00 : f32
    %13 = vector.broadcast %cst_7 : f32 to vector<128x128xf32>
    %14 = arith.subf %10, %13 : vector<128x128xf32>
    %15 = arith.select %12, %6, %14 : vector<128x128xi1>, vector<128x128xf32>
    %c0_8 = arith.constant 0 : index
    %c0_9 = arith.constant 0 : index
    %16 = vector.load %arg4[%c0_8, %c0_9] : memref<128x32xf32, #tpu.memory_space<vmem>>, vector<128x32xf32>
    %cst_10 = arith.constant dense<0.000000e+00> : vector<128x32xf32>
    %17 = tpu.matmul %15, %16, %cst_10 {dimension_numbers = #tpu.dot_dimension_numbers<[1], [0], [0], [1], [0, 0, 1, 1], [], []>} : vector<128x128xf32>, vector<128x32xf32>, vector<128x32xf32> -> vector<128x32xf32>
    %c0_11 = arith.constant 0 : index
    %c0_12 = arith.constant 0 : index
    %18 = vector.load %arg5[%c0_11, %c0_12] : memref<1x32xf32, #tpu.memory_space<vmem>>, vector<1x32xf32>
    %19 = vector.broadcast %18 : vector<1x32xf32> to vector<128x32xf32>
    %20 = arith.addf %17, %19 : vector<128x32xf32>
    %cst_13 = arith.constant 0.000000e+00 : f32
    %21 = vector.broadcast %cst_13 : f32 to vector<128x32xf32>
    %22 = arith.subf %21, %7 : vector<128x32xf32>
    %23 = math.exp %22 : vector<128x32xf32>
    %cst_14 = arith.constant 1.000000e+00 : f32
    %24 = vector.broadcast %cst_14 : f32 to vector<128x32xf32>
    %25 = arith.addf %24, %23 : vector<128x32xf32>
    %26 = tpu.reciprocal %25 : vector<128x32xf32> -> vector<128x32xf32>
    %27 = arith.mulf %26, %20 : vector<128x32xf32>
    %cst_15 = arith.constant 1.000000e+00 : f32
    %28 = vector.broadcast %cst_15 : f32 to vector<128x32xf32>
    %29 = arith.subf %28, %26 : vector<128x32xf32>
    %30 = arith.mulf %29, %0 : vector<128x32xf32>
    %31 = arith.addf %27, %30 : vector<128x32xf32>
    %cst_16 = arith.constant dense<0.000000e+00> : vector<128xf32>
    %32 = vector.multi_reduction <add>, %31, %cst_16 [1] : vector<128x32xf32> to vector<128xf32>
    %33 = vector.shape_cast %32 : vector<128xf32> to vector<128x1xf32>
    %cst_17 = arith.constant 3.125000e-02 : f32
    %34 = vector.broadcast %cst_17 : f32 to vector<128x1xf32>
    %35 = arith.mulf %33, %34 : vector<128x1xf32>
    %36 = vector.broadcast %35 : vector<128x1xf32> to vector<128x32xf32>
    %37 = arith.subf %31, %36 : vector<128x32xf32>
    %38 = arith.mulf %37, %37 : vector<128x32xf32>
    %cst_18 = arith.constant dense<0.000000e+00> : vector<128xf32>
    %39 = vector.multi_reduction <add>, %38, %cst_18 [1] : vector<128x32xf32> to vector<128xf32>
    %40 = vector.shape_cast %39 : vector<128xf32> to vector<128x1xf32>
    %cst_19 = arith.constant 3.125000e-02 : f32
    %41 = vector.broadcast %cst_19 : f32 to vector<128x1xf32>
    %42 = arith.mulf %40, %41 : vector<128x1xf32>
    %cst_20 = arith.constant 9.99999974E-6 : f32
    %43 = vector.broadcast %cst_20 : f32 to vector<128x1xf32>
    %44 = arith.addf %42, %43 : vector<128x1xf32>
    %45 = math.rsqrt %44 : vector<128x1xf32>
    %46 = vector.broadcast %45 : vector<128x1xf32> to vector<128x32xf32>
    %47 = arith.mulf %37, %46 : vector<128x32xf32>
    %c0_21 = arith.constant 0 : index
    %c0_22 = arith.constant 0 : index
    %48 = vector.load %arg6[%c0_21, %c0_22] : memref<1x32xf32, #tpu.memory_space<vmem>>, vector<1x32xf32>
    %49 = vector.broadcast %48 : vector<1x32xf32> to vector<128x32xf32>
    %50 = arith.mulf %47, %49 : vector<128x32xf32>
    %c0_23 = arith.constant 0 : index
    %c0_24 = arith.constant 0 : index
    %51 = vector.load %arg7[%c0_23, %c0_24] : memref<1x32xf32, #tpu.memory_space<vmem>>, vector<1x32xf32>
    %52 = vector.broadcast %51 : vector<1x32xf32> to vector<128x32xf32>
    %53 = arith.addf %50, %52 : vector<128x32xf32>
    %c0_25 = arith.constant 0 : index
    %c0_26 = arith.constant 0 : index
    %54 = vector.load %arg8[%c0_25, %c0_26] : memref<128x32xf32, #tpu.memory_space<vmem>>, vector<128x32xf32>
    tpu.vector_store %arg8[%c0_25, %c0_26], %53 {strides = array<i32>} : memref<128x32xf32, #tpu.memory_space<vmem>>, vector<128x32xf32>,
    return
  }
  func.func @transform_0(%arg0: i32) -> (i32, i32) {
    %c0_i32 = arith.constant 0 : i32
    %c0_i32_0 = arith.constant 0 : i32
    return %arg0, %c0_i32 : i32, i32
  }
  func.func @transform_1(%arg0: i32) -> (i32, i32) {
    %c0_i32 = arith.constant 0 : i32
    %c0_i32_0 = arith.constant 0 : i32
    %c0_i32_1 = arith.constant 0 : i32
    return %c0_i32, %c0_i32_0 : i32, i32
  }
  func.func @transform_2(%arg0: i32) -> (i32, i32) {
    %c0_i32 = arith.constant 0 : i32
    %c0_i32_0 = arith.constant 0 : i32
    %c0_i32_1 = arith.constant 0 : i32
    return %c0_i32, %c0_i32_0 : i32, i32
  }
  func.func @transform_3(%arg0: i32) -> (i32, i32) {
    %c0_i32 = arith.constant 0 : i32
    %c0_i32_0 = arith.constant 0 : i32
    %c0_i32_1 = arith.constant 0 : i32
    return %c0_i32, %c0_i32_0 : i32, i32
  }
  func.func @transform_4(%arg0: i32) -> (i32, i32) {
    %c0_i32 = arith.constant 0 : i32
    %c0_i32_0 = arith.constant 0 : i32
    %c0_i32_1 = arith.constant 0 : i32
    return %c0_i32, %c0_i32_0 : i32, i32
  }
  func.func @transform_5(%arg0: i32) -> (i32, i32) {
    %c0_i32 = arith.constant 0 : i32
    %c0_i32_0 = arith.constant 0 : i32
    %c0_i32_1 = arith.constant 0 : i32
    return %c0_i32, %c0_i32_0 : i32, i32
  }
  func.func @transform_6(%arg0: i32) -> (i32, i32) {
    %c0_i32 = arith.constant 0 : i32
    %c0_i32_0 = arith.constant 0 : i32
    %c0_i32_1 = arith.constant 0 : i32
    return %c0_i32, %c0_i32_0 : i32, i32
  }
  func.func @transform_7(%arg0: i32) -> (i32, i32) {
    %c0_i32 = arith.constant 0 : i32
    %c0_i32_0 = arith.constant 0 : i32
    return %arg0, %c0_i32 : i32, i32
  }
}

</mosaic_0001>

<bundles_post_ra>
// kernel: tpu_custom_call.1
= control target key start
LH: loop header
LB: loop body
LE: loop exit
PB: predicated region body
PF: predicated region fallthrough
CT: control target
= control target key end

     0   :  { %v1246_v3 = vmov 0.0   ;;  %vm62_vm0 = vcmask 261120   ;;  %v52_v53 = vlaneseq  ;;  %s1901_s1 = inlined_call_operand.vmem [shape: f32[32,160], index: 1, kind: input, shape index: {}]   ;;  %s1902_s0 = inlined_call_operand.vmem [shape: f32[128,32], index: 0, kind: input, shape index: {}]   ;;  %s1903_s3 = inlined_call_operand.vmem [shape: f32[128,32], index: 3, kind: input, shape index: {}]   ;;  %s1904_s2 = inlined_call_operand.vmem [shape: f32[1,160], index: 2, kind: input, shape index: {}]   ;;  %s1905_s4 = inlined_call_operand.vmem [shape: f32[1,32], index: 4, kind: input, shape index: {}]   ;;  %s1906_s5 = inlined_call_operand.vmem [shape: f32[1,32], index: 5, kind: input, shape index: {}]   ;;  %s1907_s6 = inlined_call_operand.vmem [shape: f32[1,32], index: 6, kind: input, shape index: {}]   ;;  %s1908_s7 = inlined_call_operand.vmem [shape: f32[128,32], index: 7, kind: output, shape index: {}]  }
   0x1   :  { %v43_v0 = vld [vmem:[%s1901_s1 + $0x8] sm:$0xff]  ;;  %v45_v1 = vld [vmem:[%s1901_s1 + $0x18] sm:$0xff]  ;;  %v42_v2 = vld [vmem:[%s1901_s1] sm:$0xff]  ;;  %175 = vmatprep.mubr.f32.mxu0 %v1246_v3 }
   0x2   :  { %v1077_v4 = vpack.c.bf16 %v45_v1, %v43_v0  ;;  %v44_v5 = vld [vmem:[%s1901_s1 + $0x10] sm:$0xff]  ;;  %v47_v6 = vld [vmem:[%s1901_s1 + $0x28] sm:$0xff]  ;;  %v49_v7 = vld [vmem:[%s1901_s1 + $0x38] sm:$0xff]  ;;  %v1487_v54 = vshrl.u32 %v52_v53, 7 }
   0x3   :  { %v1079_v8 = vpack.c.bf16 %v44_v5, %v42_v2  ;;  %v1081_v9 = vpack.c.bf16 %v49_v7, %v47_v6  ;;  %v46_v10 = vld [vmem:[%s1901_s1 + $0x20] sm:$0xff]  ;;  %v48_v11 = vld [vmem:[%s1901_s1 + $0x30] sm:$0xff]  ;;  %v369_v15 = vld [vmem:[%s1903_s3 + $0x8] sm:$0xff] }
   0x4   :  { %1078 = vmatprep.subr.bf16.mxu0 %v1077_v4  ;;  %v1083_v12 = vpack.c.bf16 %v48_v11, %v46_v10  ;;  %v1315_v13 = vld [vmem:[%s1902_s0] sm:$0xff]  ;;  %v370_v16 = vld [vmem:[%s1903_s3 + $0x10] sm:$0xff]  ;;  %v371_v18 = vld [vmem:[%s1903_s3 + $0x18] sm:$0xff]  ;;  %v54_v55 = vsub.s32 0, %v1487_v54 }
   0x5   :  { %1080 = vmatpush1.bf16.msra.mxu0 %v1079_v8  ;;  %v368_v14 = vld [vmem:[%s1903_s3] sm:$0xff]  ;;  %v1089_v19 = vpack.c.bf16 %v371_v18, %v370_v16  ;;  %v1335_v20 = vld [vmem:[%s1902_s0 + $0x8] sm:$0xff]  ;;  %v1343_v21 = vld [vmem:[%s1902_s0 + $0x10] sm:$0xff] }
   0x6   :  { %1082 = vmatprep.subr.bf16.mxu0 %v1081_v9  ;;  %v1085_v17 = vpack.c.bf16 %v369_v15, %v368_v14  ;;  %v1351_v22 = vld [vmem:[%s1902_s0 + $0x18] sm:$0xff]  ;;  %v1359_v23 = vld [vmem:[%s1902_s0 + $0x20] sm:$0xff]  ;;  %v1367_v24 = vld [vmem:[%s1902_s0 + $0x28] sm:$0xff] }
   0x7   :  { %v1375_v25 = vld [vmem:[%s1902_s0 + $0x30] sm:$0xff]  ;;  %v1383_v26 = vld [vmem:[%s1902_s0 + $0x38] sm:$0xff]  ;;  %v1391_v27 = vld [vmem:[%s1902_s0 + $0x40] sm:$0xff] }
   0x8   :  { %1086 = vmatprep.subr.bf16.mxu1 %v1085_v17  ;;  %v1399_v28 = vld [vmem:[%s1902_s0 + $0x48] sm:$0xff]  ;;  %v1407_v29 = vld [vmem:[%s1902_s0 + $0x50] sm:$0xff]  ;;  %v1415_v30 = vld [vmem:[%s1902_s0 + $0x58] sm:$0xff] }
   0x9   :  { %1084 = vmatpush1.bf16.msra.mxu0 %v1083_v12  ;;  %1088 = vmatpush3.bf16.msra.mxu1 %v1085_v17  ;;  %v1423_v31 = vld [vmem:[%s1902_s0 + $0x60] sm:$0xff]  ;;  %v1431_v32 = vld [vmem:[%s1902_s0 + $0x68] sm:$0xff]  ;;  %v1439_v33 = vld [vmem:[%s1902_s0 + $0x70] sm:$0xff] }
   0xa   :  { %1090 = vmatprep.subr.bf16.mxu1 %v1089_v19  ;;  %v1447_v34 = vld [vmem:[%s1902_s0 + $0x78] sm:$0xff]  ;;  %v372_v35 = vld [vmem:[%s1903_s3 + $0x20] sm:$0xff]  ;;  %v373_v36 = vld [vmem:[%s1903_s3 + $0x28] sm:$0xff] }
   0xb   :  { %v1093_v37 = vpack.c.bf16 %v373_v36, %v372_v35  ;;  %v374_v38 = vld [vmem:[%s1903_s3 + $0x30] sm:$0xff]  ;;  %v375_v39 = vld [vmem:[%s1903_s3 + $0x38] sm:$0xff]  ;;  %v376_v41 = vld [vmem:[%s1903_s3 + $0x40] sm:$0xff] }
   0xc   :  { %954 = vmatmul.mubr.msk.f32.vlgmr.msra.gmra.mrb[0].mxu0 %vm62_vm0, %v1315_v13  ;;  %v1097_v40 = vpack.c.bf16 %v375_v39, %v374_v38  ;;  %v377_v42 = vld [vmem:[%s1903_s3 + $0x48] sm:$0xff]  ;;  %v378_v44 = vld [vmem:[%s1903_s3 + $0x50] sm:$0xff]  ;;  %v379_v45 = vld [vmem:[%s1903_s3 + $0x58] sm:$0xff] }
   0xd   :  { %181 = vmatprep.mubr.f32.mxu0 %v1246_v3  ;;  %1092 = vmatpush3.bf16.msra.mxu1 %v1089_v19  ;;  %v1101_v43 = vpack.c.bf16 %v377_v42, %v376_v41  ;;  %v1105_v46 = vpack.c.bf16 %v379_v45, %v378_v44  ;;  %v380_v47 = vld [vmem:[%s1903_s3 + $0x60] sm:$0xff]  ;;  %v381_v48 = vld [vmem:[%s1903_s3 + $0x68] sm:$0xff]  ;;  %v382_v50 = vld [vmem:[%s1903_s3 + $0x70] sm:$0xff] }
   0xe   :  { %1094 = vmatprep.subr.bf16.mxu1 %v1093_v37  ;;  %v1109_v49 = vpack.c.bf16 %v381_v48, %v380_v47  ;;  %v383_v51 = vld [vmem:[%s1903_s3 + $0x78] sm:$0xff]  ;;  %v1493_v56 = vld [vmem:[%s1904_s2] sm:$0x3] }
   0xf   :  { %v1113_v52 = vpack.c.bf16 %v383_v51, %v382_v50  ;;  %v1496_v57 = vrot.slane %v1493_v56, %v54_v55 }
  0x10   :  { %955 = vmatmul.mubr.msk.f32.gmra.mrb[2].mxu0 %vm62_vm0, %v1335_v20 }
  0x11   :  { %187 = vmatprep.mubr.f32.mxu0 %v1246_v3  ;;  %1096 = vmatpush3.bf16.msra.mxu1 %v1093_v37 }
  0x12   :  { %1098 = vmatprep.subr.bf16.mxu1 %v1097_v40 }
  0x14   :  { %956 = vmatmul.mubr.msk.f32.gmra.mrb[4].mxu0 %vm62_vm0, %v1343_v21 }
  0x15   :  { %193 = vmatprep.mubr.f32.mxu0 %v1246_v3  ;;  %1100 = vmatpush3.bf16.msra.mxu1 %v1097_v40 }
  0x16   :  { %1102 = vmatprep.subr.bf16.mxu1 %v1101_v43 }
  0x18   :  { %957 = vmatmul.mubr.msk.f32.gmra.mrb[6].mxu0 %vm62_vm0, %v1351_v22 }
  0x19   :  { %199 = vmatprep.mubr.f32.mxu0 %v1246_v3  ;;  %1104 = vmatpush3.bf16.msra.mxu1 %v1101_v43 }
  0x1a   :  { %1106 = vmatprep.subr.bf16.mxu1 %v1105_v46 }
  0x1c   :  { %958 = vmatmul.mubr.msk.f32.gmra.mrb[8].mxu0 %vm62_vm0, %v1359_v23 }
  0x1d   :  { %205 = vmatprep.mubr.f32.mxu0 %v1246_v3  ;;  %1108 = vmatpush3.bf16.msra.mxu1 %v1105_v46 }
  0x1e   :  { %1110 = vmatprep.subr.bf16.mxu1 %v1109_v49 }
  0x20   :  { %959 = vmatmul.mubr.msk.f32.gmra.mrb[10].mxu0 %vm62_vm0, %v1367_v24 }
  0x21   :  { %211 = vmatprep.mubr.f32.mxu0 %v1246_v3  ;;  %1112 = vmatpush3.bf16.msra.mxu1 %v1109_v49 }
  0x22   :  { %1114 = vmatprep.subr.bf16.mxu1 %v1113_v52 }
  0x24   :  { %960 = vmatmul.mubr.msk.f32.gmra.mrb[12].mxu0 %vm62_vm0, %v1375_v25 }
  0x25   :  { %217 = vmatprep.mubr.f32.mxu0 %v1246_v3  ;;  %1116 = vmatpush3.bf16.msra.mxu1 %v1113_v52 }
  0x28   :  { %961 = vmatmul.mubr.msk.f32.gmra.mrb[14].mxu0 %vm62_vm0, %v1383_v26 }
  0x29   :  { %223 = vmatprep.mubr.f32.mxu0 %v1246_v3 }
  0x2c   :  { %962 = vmatmul.mubr.msk.f32.gmra.mrb[16].mxu0 %vm62_vm0, %v1391_v27 }
  0x2d   :  { %229 = vmatprep.mubr.f32.mxu0 %v1246_v3 }
  0x30   :  { %963 = vmatmul.mubr.msk.f32.gmra.mrb[18].mxu0 %vm62_vm0, %v1399_v28 }
  0x31   :  { %235 = vmatprep.mubr.f32.mxu0 %v1246_v3 }
  0x34   :  { %964 = vmatmul.mubr.msk.f32.gmra.mrb[20].mxu0 %vm62_vm0, %v1407_v29 }
  0x35   :  { %241 = vmatprep.mubr.f32.mxu0 %v1246_v3 }
  0x38   :  { %965 = vmatmul.mubr.msk.f32.gmra.mrb[22].mxu0 %vm62_vm0, %v1415_v30 }
  0x39   :  { %247 = vmatprep.mubr.f32.mxu0 %v1246_v3 }
  0x3c   :  { %966 = vmatmul.mubr.msk.f32.gmra.mrb[24].mxu0 %vm62_vm0, %v1423_v31 }
  0x3d   :  { %253 = vmatprep.mubr.f32.mxu0 %v1246_v3 }
  0x40   :  { %967 = vmatmul.mubr.msk.f32.gmra.mrb[26].mxu0 %vm62_vm0, %v1431_v32 }
  0x41   :  { %259 = vmatprep.mubr.f32.mxu0 %v1246_v3 }
  0x44   :  { %968 = vmatmul.mubr.msk.f32.gmra.mrb[28].mxu0 %vm62_vm0, %v1439_v33 }
  0x45   :  { %265 = vmatprep.mubr.f32.mxu0 %v1246_v3 }
  0x48   :  { %969 = vmatmul.mubr.msk.f32.gmra.mrb[30].mxu0 %vm62_vm0, %v1447_v34 }
  0xdf   :  { %v177_v58 = vpop.f32.mrb[0].mxu0 }
  0xe0   :  { %v178_v59 = vadd.f32 %v177_v58, %v1496_v57  ;;  %v1499_v60 = vpop.f32.mrb[1].mxu0 }
  0xe2   :  { %v272_v61 = vmin.f32 %v178_v59, 0.0  ;;  %vm320_vm1 = vcmp.gt.f32.partialorder %v178_v59, 0.0 }
  0xe3   :  { %v183_v62 = vpop.f32.mrb[2].mxu0 }
  0xe4   :  { %v288_v63 = vmul.f32 1.442695, %v272_v61  ;;  %v184_v0 = vadd.f32 %v183_v62, %v1496_v57  ;;  %v1502_v1 = vpop.f32.mrb[3].mxu0 }
  0xe6   :  { %1118 = vpow2.f32 %v288_v63  ;;  %v273_v2 = vmin.f32 %v184_v0, 0.0  ;;  %vm321_vm2 = vcmp.gt.f32.partialorder %v184_v0, 0.0 }
  0xe7   :  { %v189_v3 = vpop.f32.mrb[4].mxu0 }
  0xe8   :  { %v290_v4 = vmul.f32 1.442695, %v273_v2  ;;  %v190_v5 = vadd.f32 %v189_v3, %v1496_v57  ;;  %v1505_v6 = vpop.f32.mrb[5].mxu0 }
  0xea   :  { %1120 = vpow2.f32 %v290_v4  ;;  %v274_v7 = vmin.f32 %v190_v5, 0.0  ;;  %vm322_vm3 = vcmp.gt.f32.partialorder %v190_v5, 0.0 }
  0xeb   :  { %v195_v8 = vpop.f32.mrb[6].mxu0 }
  0xec   :  { %v292_v9 = vmul.f32 1.442695, %v274_v7  ;;  %v196_v10 = vadd.f32 %v195_v8, %v1496_v57  ;;  %v1508_v11 = vpop.f32.mrb[7].mxu0 }
  0xee   :  { %1122 = vpow2.f32 %v292_v9  ;;  %v275_v12 = vmin.f32 %v196_v10, 0.0  ;;  %vm323_vm4 = vcmp.gt.f32.partialorder %v196_v10, 0.0 }
  0xef   :  { %v201_v14 = vpop.f32.mrb[8].mxu0 }
  0xf0   :  { %v1119_v15 = vpop.eup %1118  ;;  %v294_v16 = vmul.f32 1.442695, %v275_v12  ;;  %v202_v17 = vadd.f32 %v201_v14, %v1496_v57  ;;  %v1511_v18 = vpop.f32.mrb[9].mxu0 }
  0xf1   :  { %v970_v19 = vadd.f32 -1.0, %v1119_v15 }
  0xf2   :  { %1124 = vpow2.f32 %v294_v16  ;;  %v276_v35 = vmin.f32 %v202_v17, 0.0  ;;  %vm324_vm5 = vcmp.gt.f32.partialorder %v202_v17, 0.0 }
  0xf3   :  { %v207_v36 = vpop.f32.mrb[10].mxu0  ;;  %v352_v37 = vsel %vm320_vm1, %v178_v59, %v970_v19 }
  0xf4   :  { %v1121_v38 = vpop.eup %1120  ;;  %v296_v39 = vmul.f32 1.442695, %v276_v35  ;;  %v208_v40 = vadd.f32 %v207_v36, %v1496_v57  ;;  %v1514_v41 = vpop.f32.mrb[11].mxu0  ;;  %1053 = vmatprep.mubr.f32.mxu1 %v352_v37 }
  0xf5   :  { %v971_v42 = vadd.f32 -1.0, %v1121_v38 }
  0xf6   :  { %1126 = vpow2.f32 %v296_v39  ;;  %v277_v43 = vmin.f32 %v208_v40, 0.0  ;;  %vm325_vm6 = vcmp.gt.f32.partialorder %v208_v40, 0.0 }
  0xf7   :  { %v213_v44 = vpop.f32.mrb[12].mxu0  ;;  %v353_v45 = vsel %vm321_vm2, %v184_v0, %v971_v42 }
  0xf8   :  { %v1123_v46 = vpop.eup %1122  ;;  %v298_v47 = vmul.f32 1.442695, %v277_v43  ;;  %v214_v48 = vadd.f32 %v213_v44, %v1496_v57  ;;  %v1517_v49 = vpop.f32.mrb[13].mxu0  ;;  %1054 = vmatmul.mubr.f32.vlgmr.msra.gmra.mrb[0].mxu1 %v353_v45 }
  0xf9   :  { %v972_v50 = vadd.f32 -1.0, %v1123_v46 }
  0xfa   :  { %1128 = vpow2.f32 %v298_v47  ;;  %v278_v51 = vmin.f32 %v214_v48, 0.0  ;;  %vm326_vm7 = vcmp.gt.f32.partialorder %v214_v48, 0.0 }
  0xfb   :  { %v219_v52 = vpop.f32.mrb[14].mxu0  ;;  %v354_v53 = vsel %vm322_vm3, %v190_v5, %v972_v50 }
  0xfc   :  { %v1125_v55 = vpop.eup %1124  ;;  %v300_v58 = vmul.f32 1.442695, %v278_v51  ;;  %v220_v59 = vadd.f32 %v219_v52, %v1496_v57  ;;  %v1520_v61 = vpop.f32.mrb[15].mxu0  ;;  %1056 = vmatprep.mubr.f32.mxu1 %v354_v53 }
  0xfd   :  { %v973_v62 = vadd.f32 -1.0, %v1125_v55 }
  0xfe   :  { %1130 = vpow2.f32 %v300_v58  ;;  %v279_v63 = vmin.f32 %v220_v59, 0.0  ;;  %vm327_vm8 = vcmp.gt.f32.partialorder %v220_v59, 0.0 }
  0xff   :  { %v225_v0 = vpop.f32.mrb[16].mxu0  ;;  %v355_v2 = vsel %vm323_vm4, %v196_v10, %v973_v62 }
 0x100   :  { %v1127_v3 = vpop.eup %1126  ;;  %v302_v4 = vmul.f32 1.442695, %v279_v63  ;;  %v226_v7 = vadd.f32 %v225_v0, %v1496_v57  ;;  %v1523_v8 = vpop.f32.mrb[17].mxu0  ;;  %1057 = vmatmul.mubr.f32.gmra.mrb[2].mxu1 %v355_v2 }
 0x101   :  { %v974_v5 = vadd.f32 -1.0, %v1127_v3 }
 0x102   :  { %1132 = vpow2.f32 %v302_v4  ;;  %v280_v9 = vmin.f32 %v226_v7, 0.0  ;;  %vm328_vm9 = vcmp.gt.f32.partialorder %v226_v7, 0.0 }
 0x103   :  { %v231_v12 = vpop.f32.mrb[18].mxu0  ;;  %v356_v14 = vsel %vm324_vm5, %v202_v17, %v974_v5 }
 0x104   :  { %v1129_v15 = vpop.eup %1128  ;;  %v304_v16 = vmul.f32 1.442695, %v280_v9  ;;  %v232_v19 = vadd.f32 %v231_v12, %v1496_v57  ;;  %v1526_v35 = vpop.f32.mrb[19].mxu0  ;;  %1059 = vmatprep.mubr.f32.mxu1 %v356_v14 }
 0x105   :  { %v975_v10 = vadd.f32 -1.0, %v1129_v15 }
 0x106   :  { %1134 = vpow2.f32 %v304_v16  ;;  %v281_v36 = vmin.f32 %v232_v19, 0.0  ;;  %vm329_vm10 = vcmp.gt.f32.partialorder %v232_v19, 0.0 }
 0x107   :  { %v237_v37 = vpop.f32.mrb[20].mxu0  ;;  %v357_v38 = vsel %vm325_vm6, %v208_v40, %v975_v10 }
 0x108   :  { %v1131_v39 = vpop.eup %1130  ;;  %v306_v42 = vmul.f32 1.442695, %v281_v36  ;;  %v238_v43 = vadd.f32 %v237_v37, %v1496_v57  ;;  %v1529_v44 = vpop.f32.mrb[21].mxu0  ;;  %1060 = vmatmul.mubr.f32.gmra.mrb[4].mxu1 %v357_v38 }
 0x109   :  { %v976_v17 = vadd.f32 -1.0, %v1131_v39 }
 0x10a   :  { %1136 = vpow2.f32 %v306_v42  ;;  %v282_v45 = vmin.f32 %v238_v43, 0.0  ;;  %vm330_vm11 = vcmp.gt.f32.partialorder %v238_v43, 0.0 }
 0x10b   :  { %v243_v46 = vpop.f32.mrb[22].mxu0  ;;  %v358_v47 = vsel %vm326_vm7, %v214_v48, %v976_v17 }
 0x10c   :  { %v1133_v50 = vpop.eup %1132  ;;  %v308_v51 = vmul.f32 1.442695, %v282_v45  ;;  %v244_v52 = vadd.f32 %v243_v46, %v1496_v57  ;;  %v1532_v53 = vpop.f32.mrb[23].mxu0  ;;  %1062 = vmatprep.mubr.f32.mxu1 %v358_v47 }
 0x10d   :  { %v977_v40 = vadd.f32 -1.0, %v1133_v50 }
 0x10e   :  { %1138 = vpow2.f32 %v308_v51  ;;  %v283_v55 = vmin.f32 %v244_v52, 0.0  ;;  %vm331_vm12 = vcmp.gt.f32.partialorder %v244_v52, 0.0 }
 0x10f   :  { %v249_v58 = vpop.f32.mrb[24].mxu0  ;;  %v359_v62 = vsel %vm327_vm8, %v220_v59, %v977_v40 }
 0x110   :  { %v1135_v63 = vpop.eup %1134  ;;  %v310_v0 = vmul.f32 1.442695, %v283_v55  ;;  %v250_v2 = vadd.f32 %v249_v58, %v1496_v57  ;;  %v1535_v3 = vpop.f32.mrb[25].mxu0  ;;  %1063 = vmatmul.mubr.f32.gmra.mrb[6].mxu1 %v359_v62 }
 0x111   :  { %v978_v48 = vadd.f32 -1.0, %v1135_v63 }
 0x112   :  { %1140 = vpow2.f32 %v310_v0  ;;  %v284_v4 = vmin.f32 %v250_v2, 0.0  ;;  %vm332_vm13 = vcmp.gt.f32.partialorder %v250_v2, 0.0 }
 0x113   :  { %v255_v5 = vpop.f32.mrb[26].mxu0  ;;  %v360_v9 = vsel %vm328_vm9, %v226_v7, %v978_v48 }
 0x114   :  { %v1137_v12 = vpop.eup %1136  ;;  %v312_v14 = vmul.f32 1.442695, %v284_v4  ;;  %v256_v15 = vadd.f32 %v255_v5, %v1496_v57  ;;  %v1538_v16 = vpop.f32.mrb[27].mxu0  ;;  %1065 = vmatprep.mubr.f32.mxu1 %v360_v9 }
 0x115   :  { %v979_v59 = vadd.f32 -1.0, %v1137_v12 }
 0x116   :  { %1142 = vpow2.f32 %v312_v14  ;;  %v285_v10 = vmin.f32 %v256_v15, 0.0  ;;  %vm333_vm14 = vcmp.gt.f32.partialorder %v256_v15, 0.0 }
 0x117   :  { %v261_v36 = vpop.f32.mrb[28].mxu0  ;;  %v361_v37 = vsel %vm329_vm10, %v232_v19, %v979_v59 }
 0x118   :  { %v1139_v38 = vpop.eup %1138  ;;  %v314_v39 = vmul.f32 1.442695, %v285_v10  ;;  %v262_v42 = vadd.f32 %v261_v36, %v1496_v57  ;;  %v1541_v17 = vpop.f32.mrb[29].mxu0  ;;  %1066 = vmatmul.mubr.f32.gmra.mrb[8].mxu1 %v361_v37  ;;  %v58_v36 = vsub.s32 1, %v1487_v54 }
 0x119   :  { %v980_v7 = vadd.f32 -1.0, %v1139_v38 }
 0x11a   :  { %1144 = vpow2.f32 %v314_v39  ;;  %v286_v45 = vmin.f32 %v262_v42, 0.0  ;;  %vm334_vm15 = vcmp.gt.f32.partialorder %v262_v42, 0.0 }
 0x11b   :  { %v267_v46 = vpop.f32.mrb[30].mxu0  ;;  %v362_v47 = vsel %vm330_vm11, %v238_v43, %v980_v7 }
 0x11c   :  { %v1141_v50 = vpop.eup %1140  ;;  %v316_v51 = vmul.f32 1.442695, %v286_v45  ;;  %v268_v40 = vadd.f32 %v267_v46, %v1496_v57  ;;  %v1544_v55 = vpop.f32.mrb[31].mxu0  ;;  %1068 = vmatprep.mubr.f32.mxu1 %v362_v47 }
 0x11d   :  { %v981_v19 = vadd.f32 -1.0, %v1141_v50 }
 0x11e   :  { %1146 = vpow2.f32 %v316_v51  ;;  %v287_v58 = vmin.f32 %v268_v40, 0.0  ;;  %vm335_vm1 = vcmp.gt.f32.partialorder %v268_v40, 0.0 }
 0x11f   :  { %v363_v62 = vsel %vm331_vm12, %v244_v52, %v981_v19 }
 0x120   :  { %v1143_v63 = vpop.eup %1142  ;;  %v318_v0 = vmul.f32 1.442695, %v287_v58  ;;  %1069 = vmatmul.mubr.f32.gmra.mrb[10].mxu1 %v363_v62 }
 0x121   :  { %v982_v48 = vadd.f32 -1.0, %v1143_v63 }
 0x122   :  { %1148 = vpow2.f32 %v318_v0 }
 0x123   :  { %v364_v4 = vsel %vm332_vm13, %v250_v2, %v982_v48  ;;  %v1548_v2 = vrot.slane %v1493_v56, %v58_v36 }
 0x124   :  { %v1145_v43 = vpop.eup %1144  ;;  %1071 = vmatprep.mubr.f32.mxu1 %v364_v4 }
 0x125   :  { %v983_v5 = vadd.f32 -1.0, %v1145_v43  ;;  %v186_v37 = vadd.f32 %v1502_v1, %v1548_v2  ;;  %v198_v7 = vadd.f32 %v1508_v11, %v1548_v2  ;;  %v192_v46 = vadd.f32 %v1505_v6, %v1548_v2 }
 0x126   :  { %v204_v1 = vadd.f32 %v1511_v18, %v1548_v2  ;;  %v216_v6 = vadd.f32 %v1517_v49, %v1548_v2  ;;  %v222_v63 = vadd.f32 %v1520_v61, %v1548_v2  ;;  %v234_v49 = vadd.f32 %v1526_v35, %v1548_v2 }
 0x127   :  { %v365_v57 = vsel %vm333_vm14, %v256_v15, %v983_v5  ;;  %v180_v15 = vadd.f32 %v1499_v60, %v1548_v2  ;;  %v537_v38 = vsub.f32 0.0, %v186_v37  ;;  %v539_v54 = vsub.f32 0.0, %v198_v7 }
 0x128   :  { %v1147_v9 = vpop.eup %1146  ;;  %1072 = vmatmul.mubr.f32.gmra.mrb[12].mxu1 %v365_v57  ;;  %v538_v56 = vsub.f32 0.0, %v192_v46  ;;  %v210_v60 = vadd.f32 %v1514_v41, %v1548_v2  ;;  %v540_v51 = vsub.f32 0.0, %v204_v1  ;;  %v542_v48 = vsub.f32 0.0, %v216_v6 }
 0x129   :  { %v984_v12 = vadd.f32 -1.0, %v1147_v9  ;;  %v536_v39 = vsub.f32 0.0, %v180_v15  ;;  %v558_v47 = vmul.f32 1.442695, %v539_v54  ;;  %v543_v41 = vsub.f32 0.0, %v222_v63 }
 0x12a   :  { %v556_v50 = vmul.f32 1.442695, %v538_v56  ;;  %v560_v58 = vmul.f32 1.442695, %v540_v51  ;;  %v564_v5 = vmul.f32 1.442695, %v542_v48  ;;  %v228_v57 = vadd.f32 %v1523_v8, %v1548_v2 }
 0x12b   :  { %v366_v14 = vsel %vm334_vm15, %v262_v42, %v984_v12  ;;  %v554_v42 = vmul.f32 1.442695, %v537_v38  ;;  %v552_v45 = vmul.f32 1.442695, %v536_v39  ;;  %v566_v9 = vmul.f32 1.442695, %v543_v41 }
 0x12c   :  { %v1149_v59 = vpop.eup %1148  ;;  %1074 = vmatprep.mubr.f32.mxu1 %v366_v14  ;;  %v544_v14 = vsub.f32 0.0, %v228_v57  ;;  %v240_v15 = vadd.f32 %v1529_v44, %v1548_v2  ;;  %v246_v35 = vadd.f32 %v1532_v53, %v1548_v2 }
 0x12d   :  { %v985_v52 = vadd.f32 -1.0, %v1149_v59  ;;  %1150 = vpow2.f32 %v554_v42  ;;  %v545_v59 = vsub.f32 0.0, %v234_v49  ;;  %v1577_v42 = vld [vmem:[%s1905_s4] ss:$0 sm:$0xff] }
 0x12e   :  { %1152 = vpow2.f32 %v552_v45  ;;  %v568_v37 = vmul.f32 1.442695, %v544_v14  ;;  %v546_v46 = vsub.f32 0.0, %v240_v15  ;;  %v547_v1 = vsub.f32 0.0, %v246_v35 }
 0x12f   :  { %v367_v10 = vsel %vm335_vm1, %v268_v40, %v985_v52  ;;  %1154 = vpow2.f32 %v558_v47  ;;  %v541_v40 = vsub.f32 0.0, %v210_v60  ;;  %v570_v38 = vmul.f32 1.442695, %v545_v59 }
 0x130   :  { %1075 = vmatmul.mubr.f32.gmra.mrb[14].mxu1 %v367_v10  ;;  %1156 = vpow2.f32 %v556_v50  ;;  %v264_v15 = vadd.f32 %v1541_v17, %v1548_v2 }
 0x131   :  { %v562_v62 = vmul.f32 1.442695, %v541_v40  ;;  %1158 = vpow2.f32 %v560_v58  ;;  %v252_v58 = vadd.f32 %v1535_v3, %v1548_v2 }
 0x132   :  { %v550_v17 = vsub.f32 0.0, %v264_v15 }
 0x133   :  { %1160 = vpow2.f32 %v562_v62  ;;  %v548_v3 = vsub.f32 0.0, %v252_v58 }
 0x134   :  { %v580_v58 = vmul.f32 1.442695, %v550_v17 }
 0x137   :  { %v1151_v11 = vpop.eup %1150 }
 0x138   :  { %v1153_v19 = vpop.eup %1152  ;;  %v585_v18 = vadd.f32 1.0, %v1151_v11 }
 0x139   :  { %v584_v0 = vadd.f32 1.0, %v1153_v19  ;;  %v1155_v4 = vpop.eup %1154  ;;  %v572_v19 = vmul.f32 1.442695, %v546_v46 }
 0x13a   :  { %1162 = vrcp.f32 %v585_v18  ;;  %v1157_v43 = vpop.eup %1156  ;;  %v587_v12 = vadd.f32 1.0, %v1155_v4  ;;  %v574_v18 = vmul.f32 1.442695, %v547_v1 }
 0x13b   :  { %1164 = vrcp.f32 %v584_v0  ;;  %v586_v61 = vadd.f32 1.0, %v1157_v43  ;;  %v1159_v52 = vpop.eup %1158  ;;  %v258_v0 = vadd.f32 %v1538_v16, %v1548_v2 }
 0x13c   :  { %1166 = vpow2.f32 %v564_v5  ;;  %v588_v7 = vadd.f32 1.0, %v1159_v52 }
 0x13d   :  { %1168 = vpow2.f32 %v566_v9  ;;  %v1161_v10 = vpop.eup %1160  ;;  %v549_v9 = vsub.f32 0.0, %v258_v0 }
 0x13e   :  { %1170 = vrcp.f32 %v587_v12  ;;  %v589_v39 = vadd.f32 1.0, %v1161_v10 }
 0x13f   :  { %1172 = vrcp.f32 %v586_v61 }
 0x140   :  { %1174 = vpow2.f32 %v568_v37  ;;  %v576_v37 = vmul.f32 1.442695, %v548_v3 }
 0x141   :  { %1176 = vpow2.f32 %v570_v38 }
 0x142   :  { %1178 = vrcp.f32 %v589_v39  ;;  %v578_v39 = vmul.f32 1.442695, %v549_v9 }
 0x143   :  { %1180 = vrcp.f32 %v588_v7  ;;  %v270_v7 = vadd.f32 %v1544_v55, %v1548_v2 }
 0x144   :  { %v1163_v36 = vpop.eup %1162  ;;  %1182 = vpow2.f32 %v572_v19 }
 0x145   :  { %v1165_v8 = vpop.eup %1164  ;;  %v633_v45 = vsub.f32 1.0, %v1163_v36  ;;  %1184 = vpow2.f32 %v574_v18 }
 0x146   :  { %v632_v56 = vsub.f32 1.0, %v1165_v8  ;;  %v1167_v60 = vpop.eup %1166 }
 0x147   :  { %v1169_v50 = vpop.eup %1168  ;;  %v649_v40 = vmul.f32 %v633_v45, %v1335_v20  ;;  %v590_v43 = vadd.f32 1.0, %v1167_v60 }
 0x148   :  { %v1171_v11 = vpop.eup %1170  ;;  %v648_v62 = vmul.f32 %v632_v56, %v1315_v13  ;;  %v591_v41 = vadd.f32 1.0, %v1169_v50 }
 0x149   :  { %v1173_v63 = vpop.eup %1172  ;;  %v635_v5 = vsub.f32 1.0, %v1171_v11 }
 0x14a   :  { %v634_v13 = vsub.f32 1.0, %v1173_v63  ;;  %v1175_v12 = vpop.eup %1174  ;;  %1186 = vrcp.f32 %v591_v41 }
 0x14b   :  { %v1177_v14 = vpop.eup %1176  ;;  %1188 = vrcp.f32 %v590_v43  ;;  %v651_v10 = vmul.f32 %v635_v5, %v1351_v22  ;;  %v592_v22 = vadd.f32 1.0, %v1175_v12 }
 0x14c   :  { %v650_v38 = vmul.f32 %v634_v13, %v1343_v21  ;;  %v593_v46 = vadd.f32 1.0, %v1177_v14  ;;  %1190 = vpow2.f32 %v576_v37 }
 0x14d   :  { %1192 = vpow2.f32 %v578_v39 }
 0x14e   :  { %1194 = vrcp.f32 %v593_v46 }
 0x14f   :  { %1196 = vrcp.f32 %v592_v22 }
 0x150   :  { %1198 = vpow2.f32 %v580_v58 }
 0x1cb   :  { %v1055_v54 = vpop.f32.mrb[0].mxu1 }
 0x1cc   :  { %v463_v44 = vadd.f32 %v1055_v54, %v1577_v42  ;;  %v457_v47 = vpop.f32.mrb[1].mxu1 }
 0x1cd   :  { %v458_v53 = vadd.f32 %v1577_v42, %v457_v47  ;;  %v551_v47 = vsub.f32 0.0, %v270_v7 }
 0x1ce   :  { %v617_v51 = vmul.f32 %v1163_v36, %v463_v44  ;;  %v1179_v36 = vpop.eup %1178 }
 0x1cf   :  { %v616_v6 = vmul.f32 %v1165_v8, %v458_v53  ;;  %v1181_v35 = vpop.eup %1180  ;;  %v637_v1 = vsub.f32 1.0, %v1179_v36  ;;  %v582_v18 = vmul.f32 1.442695, %v551_v47 }
 0x1d0   :  { %v1587_v48 = vadd.f32 %v649_v40, %v617_v51  ;;  %v636_v21 = vsub.f32 1.0, %v1181_v35  ;;  %v1183_v2 = vpop.eup %1182 }
 0x1d1   :  { %v1589_v4 = vadd.f32 %v648_v62, %v616_v6  ;;  %v1185_v50 = vpop.eup %1184  ;;  %1200 = vpow2.f32 %v582_v18 }
 0x1d2   :  { %v683_v20 = vsel %vm62_vm0, %v1587_v48, 0.0  ;;  %v1187_v19 = vpop.eup %1186  ;;  %v652_v62 = vmul.f32 %v636_v21, %v1359_v23  ;;  %v595_v41 = vadd.f32 1.0, %v1185_v50 }
 0x1d3   :  { %684 = vadd.xlane.f32.xlu0 %v683_v20  ;;  %v1058_v57 = vpop.f32.mrb[2].mxu1  ;;  %v680_v52 = vsel %vm62_vm0, %v1589_v4, 0.0  ;;  %v594_v20 = vadd.f32 1.0, %v1183_v2  ;;  %v639_v3 = vsub.f32 1.0, %v1187_v19 }
 0x1d4   :  { %v473_v49 = vadd.f32 %v1058_v57, %v1577_v42  ;;  %v467_v16 = vpop.f32.mrb[3].mxu1  ;;  %1202 = vrcp.f32 %v595_v41 }
 0x1d5   :  { %v468_v61 = vadd.f32 %v1577_v42, %v467_v16  ;;  %1204 = vrcp.f32 %v594_v20  ;;  %v655_v14 = vmul.f32 %v639_v3, %v1383_v26 }
 0x1d6   :  { %v619_v59 = vmul.f32 %v1171_v11, %v473_v49  ;;  %v653_v11 = vmul.f32 %v637_v1, %v1367_v24 }
 0x1d7   :  { %v618_v8 = vmul.f32 %v1173_v63, %v468_v61  ;;  %681 = vadd.xlane.f32.xlu0 %v680_v52  ;;  %v1189_v63 = vpop.eup %1188 }
 0x1d8   :  { %v1603_v45 = vadd.f32 %v651_v10, %v619_v59  ;;  %v638_v13 = vsub.f32 1.0, %v1189_v63  ;;  %v1191_v49 = vpop.eup %1190 }
 0x1d9   :  { %v1605_v54 = vadd.f32 %v650_v38, %v618_v8  ;;  %v1193_v12 = vpop.eup %1192  ;;  %v596_v38 = vadd.f32 1.0, %v1191_v49 }
 0x1da   :  { %v689_v56 = vsel %vm62_vm0, %v1603_v45, 0.0  ;;  %v1195_v59 = vpop.eup %1194  ;;  %v654_v10 = vmul.f32 %v638_v13, %v1375_v25  ;;  %v597_v15 = vadd.f32 1.0, %v1193_v12 }
 0x1db   :  { %690 = vadd.xlane.f32.xlu1 %v689_v56  ;;  %v1061_v44 = vpop.f32.mrb[4].mxu1  ;;  %v686_v40 = vsel %vm62_vm0, %v1605_v54, 0.0  ;;  %v641_v39 = vsub.f32 1.0, %v1195_v59 }
 0x1dc   :  { %v483_v60 = vadd.f32 %v1061_v44, %v1577_v42  ;;  %v477_v55 = vpop.f32.mrb[5].mxu1  ;;  %1206 = vrcp.f32 %v597_v15 }
 0x1dd   :  { %v478_v53 = vadd.f32 %v1577_v42, %v477_v55  ;;  %1208 = vrcp.f32 %v596_v38  ;;  %v657_v21 = vmul.f32 %v641_v39, %v1399_v28 }
 0x1de   :  { %v621_v51 = vmul.f32 %v1179_v36, %v483_v60  ;;  %v1197_v36 = vpop.eup %1196 }
 0x1df   :  { %v620_v6 = vmul.f32 %v1181_v35, %v478_v53  ;;  %687 = vadd.xlane.f32.xlu1 %v686_v40  ;;  %v640_v46 = vsub.f32 1.0, %v1197_v36  ;;  %v1199_v56 = vpop.eup %1198 }
 0x1e0   :  { %v1615_v0 = vadd.f32 %v653_v11, %v621_v51  ;;  %v1201_v17 = vpop.eup %1200  ;;  %v598_v40 = vadd.f32 1.0, %v1199_v56 }
 0x1e1   :  { %v1617_v43 = vadd.f32 %v652_v62, %v620_v6  ;;  %v1203_v47 = vpop.eup %1202  ;;  %v656_v55 = vmul.f32 %v640_v46, %v1391_v27  ;;  %v599_v50 = vadd.f32 1.0, %v1201_v17 }
 0x1e2   :  { %v695_v5 = vsel %vm62_vm0, %v1615_v0, 0.0  ;;  %v1205_v2 = vpop.eup %1204 }
 0x1e3   :  { %v1064_v24 = vpop.f32.mrb[6].mxu1  ;;  %696 = vadd.xlane.f32.xlu1 %v695_v5  ;;  %v692_v57 = vsel %vm62_vm0, %v1617_v43, 0.0  ;;  %v642_v6 = vsub.f32 1.0, %v1205_v2  ;;  %1210 = vrcp.f32 %v599_v50 }
 0x1e4   :  { %v493_v23 = vadd.f32 %v1064_v24, %v1577_v42  ;;  %v487_v9 = vpop.f32.mrb[7].mxu1  ;;  %693 = vadd.xlane.f32.xlu0 %v692_v57  ;;  %1212 = vrcp.f32 %v598_v40 }
 0x1e5   :  { %v488_v16 = vadd.f32 %v1577_v42, %v487_v9  ;;  %v658_v3 = vmul.f32 %v642_v6, %v1407_v29 }
 0x1e6   :  { %v623_v61 = vmul.f32 %v1187_v19, %v493_v23  ;;  %v643_v19 = vsub.f32 1.0, %v1203_v47  ;;  %v1207_v20 = vpop.eup %1206 }
 0x1e7   :  { %v622_v52 = vmul.f32 %v1189_v63, %v488_v16  ;;  %v1209_v24 = vpop.eup %1208  ;;  %v645_v9 = vsub.f32 1.0, %v1207_v20 }
 0x1e8   :  { %v1627_v37 = vadd.f32 %v655_v14, %v623_v61  ;;  %v659_v41 = vmul.f32 %v643_v19, %v1415_v30  ;;  %v644_v12 = vsub.f32 1.0, %v1209_v24 }
 0x1e9   :  { %v1629_v8 = vadd.f32 %v654_v10, %v622_v52 }
 0x1ea   :  { %v701_v35 = vsel %vm62_vm0, %v1627_v37, 0.0 }
 0x1eb   :  { %v1067_v7 = vpop.f32.mrb[8].mxu1  ;;  %702 = vadd.xlane.f32.xlu1 %v701_v35  ;;  %v698_v26 = vsel %vm62_vm0, %v1629_v8, 0.0 }
 0x1ec   :  { %v503_v22 = vadd.f32 %v1067_v7, %v1577_v42  ;;  %v497_v25 = vpop.f32.mrb[9].mxu1  ;;  %699 = vadd.xlane.f32.xlu0 %v698_v26 }
 0x1ed   :  { %v498_v1 = vadd.f32 %v1577_v42, %v497_v25  ;;  %v1211_v52 = vpop.eup %1210 }
 0x1ee   :  { %v625_v44 = vmul.f32 %v1195_v59, %v503_v22  ;;  %v661_v59 = vmul.f32 %v645_v9, %v1431_v32  ;;  %v1213_v15 = vpop.eup %1212  ;;  %v647_v7 = vsub.f32 1.0, %v1211_v52 }
 0x1ef   :  { %v624_v60 = vmul.f32 %v1197_v36, %v498_v1  ;;  %v660_v36 = vmul.f32 %v644_v12, %v1423_v31  ;;  %v646_v22 = vsub.f32 1.0, %v1213_v15 }
 0x1f0   :  { %v1639_v53 = vadd.f32 %v657_v21, %v625_v44  ;;  %v663_v1 = vmul.f32 %v647_v7, %v1447_v34 }
 0x1f1   :  { %v1641_v51 = vadd.f32 %v656_v55, %v624_v60  ;;  %v662_v44 = vmul.f32 %v646_v22, %v1439_v33 }
 0x1f2   :  { %v707_v11 = vsel %vm62_vm0, %v1639_v53, 0.0 }
 0x1f3   :  { %v1070_v58 = vpop.f32.mrb[10].mxu1  ;;  %708 = vadd.xlane.f32.xlu1 %v707_v11  ;;  %v704_v28 = vsel %vm62_vm0, %v1641_v51, 0.0 }
 0x1f4   :  { %v513_v62 = vadd.f32 %v1070_v58, %v1577_v42  ;;  %v507_v27 = vpop.f32.mrb[11].mxu1  ;;  %705 = vadd.xlane.f32.xlu0 %v704_v28 }
 0x1f5   :  { %v508_v63 = vadd.f32 %v1577_v42, %v507_v27 }
 0x1f6   :  { %v627_v18 = vmul.f32 %v1203_v47, %v513_v62 }
 0x1f7   :  { %v626_v5 = vmul.f32 %v1205_v2, %v508_v63 }
 0x1f8   :  { %v1651_v57 = vadd.f32 %v659_v41, %v627_v18 }
 0x1f9   :  { %v1653_v13 = vadd.f32 %v658_v3, %v626_v5 }
 0x1fa   :  { %v713_v23 = vsel %vm62_vm0, %v1651_v57, 0.0 }
 0x1fb   :  { %v1073_v49 = vpop.f32.mrb[12].mxu1  ;;  %714 = vadd.xlane.f32.xlu1 %v713_v23  ;;  %v710_v16 = vsel %vm62_vm0, %v1653_v13, 0.0 }
 0x1fc   :  { %v523_v30 = vadd.f32 %v1073_v49, %v1577_v42  ;;  %v517_v61 = vpop.f32.mrb[13].mxu1  ;;  %711 = vadd.xlane.f32.xlu0 %v710_v16 }
 0x1fd   :  { %v518_v29 = vadd.f32 %v1577_v42, %v517_v61 }
 0x1fe   :  { %v629_v14 = vmul.f32 %v1207_v20, %v523_v30 }
 0x1ff   :  { %v628_v10 = vmul.f32 %v1209_v24, %v518_v29 }
 0x200   :  { %v1663_v38 = vadd.f32 %v661_v59, %v629_v14 }
 0x201   :  { %v1665_v35 = vadd.f32 %v660_v36, %v628_v10 }
 0x202   :  { %v719_v39 = vsel %vm62_vm0, %v1663_v38, 0.0 }
 0x203   :  { %v1076_v26 = vpop.f32.mrb[14].mxu1  ;;  %720 = vadd.xlane.f32.xlu1 %v719_v39  ;;  %v716_v46 = vsel %vm62_vm0, %v1665_v35, 0.0 }
 0x204   :  { %v533_v32 = vadd.f32 %v1076_v26, %v1577_v42  ;;  %v527_v25 = vpop.f32.mrb[15].mxu1  ;;  %717 = vadd.xlane.f32.xlu0 %v716_v46 }
 0x205   :  { %v528_v31 = vadd.f32 %v1577_v42, %v527_v25 }
 0x206   :  { %v631_v56 = vmul.f32 %v1211_v52, %v533_v32 }
 0x207   :  { %v630_v17 = vmul.f32 %v1213_v15, %v528_v31 }
 0x208   :  { %v1675_v21 = vadd.f32 %v663_v1, %v631_v56 }
 0x209   :  { %v1677_v47 = vadd.f32 %v662_v44, %v630_v17 }
 0x20a   :  { %v725_v60 = vsel %vm62_vm0, %v1675_v21, 0.0 }
 0x20b   :  { %726 = vadd.xlane.f32.xlu1 %v725_v60  ;;  %v722_v55 = vsel %vm62_vm0, %v1677_v47, 0.0 }
 0x20c   :  { %723 = vadd.xlane.f32.xlu0 %v722_v55 }
 0x260   :  { %v685_v2 = vpop.xlane.xlu0 %684 }
 0x261   :  { %v729_v42 = vmul.f32 0.03125, %v685_v2 }
 0x263   :  { %v1684_v50 = vsub.f32 %v1587_v48, %v729_v42 }
 0x264   :  { %v682_v34 = vpop.xlane.xlu0 %681 }
 0x265   :  { %v728_v40 = vmul.f32 0.03125, %v682_v34  ;;  %v761_v33 = vmul.f32 %v1684_v50, %v1684_v50 }
 0x267   :  { %v1689_v11 = vsub.f32 %v1589_v4, %v728_v40  ;;  %v779_v19 = vsel %vm62_vm0, %v761_v33, 0.0 }
 0x268   :  { %v691_v58 = vpop.xlane.xlu1 %690  ;;  %780 = vadd.xlane.f32.xlu1 %v779_v19 }
 0x269   :  { %v731_v28 = vmul.f32 0.03125, %v691_v58  ;;  %v760_v6 = vmul.f32 %v1689_v11, %v1689_v11 }
 0x26b   :  { %v1695_v62 = vsub.f32 %v1603_v45, %v731_v28  ;;  %v776_v48 = vsel %vm62_vm0, %v760_v6, 0.0 }
 0x26c   :  { %v688_v27 = vpop.xlane.xlu1 %687  ;;  %777 = vadd.xlane.f32.xlu0 %v776_v48 }
 0x26d   :  { %v730_v63 = vmul.f32 0.03125, %v688_v27  ;;  %v763_v4 = vmul.f32 %v1695_v62, %v1695_v62 }
 0x26f   :  { %v1701_v18 = vsub.f32 %v1605_v54, %v730_v63  ;;  %v785_v41 = vsel %vm62_vm0, %v763_v4, 0.0 }
 0x270   :  { %786 = vadd.xlane.f32.xlu1 %v785_v41  ;;  %v697_v20 = vpop.xlane.xlu1 %696 }
 0x271   :  { %v733_v5 = vmul.f32 0.03125, %v697_v20  ;;  %v694_v3 = vpop.xlane.xlu0 %693  ;;  %v762_v45 = vmul.f32 %v1701_v18, %v1701_v18 }
 0x272   :  { %v732_v24 = vmul.f32 0.03125, %v694_v3 }
 0x273   :  { %v1707_v23 = vsub.f32 %v1615_v0, %v733_v5  ;;  %v782_v9 = vsel %vm62_vm0, %v762_v45, 0.0 }
 0x274   :  { %v1711_v49 = vsub.f32 %v1617_v43, %v732_v24  ;;  %783 = vadd.xlane.f32.xlu0 %v782_v9 }
 0x275   :  { %v765_v54 = vmul.f32 %v1707_v23, %v1707_v23 }
 0x276   :  { %v764_v16 = vmul.f32 %v1711_v49, %v1711_v49 }
 0x277   :  { %v791_v12 = vsel %vm62_vm0, %v765_v54, 0.0 }
 0x278   :  { %792 = vadd.xlane.f32.xlu1 %v791_v12  ;;  %v703_v30 = vpop.xlane.xlu1 %702  ;;  %v788_v61 = vsel %vm62_vm0, %v764_v16, 0.0 }
 0x279   :  { %v735_v0 = vmul.f32 0.03125, %v703_v30  ;;  %789 = vadd.xlane.f32.xlu0 %v788_v61  ;;  %v700_v29 = vpop.xlane.xlu0 %699 }
 0x27a   :  { %v734_v14 = vmul.f32 0.03125, %v700_v29 }
 0x27b   :  { %v1720_v43 = vsub.f32 %v1627_v37, %v735_v0 }
 0x27c   :  { %v1723_v59 = vsub.f32 %v1629_v8, %v734_v14 }
 0x27d   :  { %v767_v52 = vmul.f32 %v1720_v43, %v1720_v43 }
 0x27e   :  { %v766_v10 = vmul.f32 %v1723_v59, %v1723_v59 }
 0x27f   :  { %v797_v36 = vsel %vm62_vm0, %v767_v52, 0.0  ;;  %v1782_v52 = vld [vmem:[%s1906_s5] ss:$0 sm:$0xff] }
 0x280   :  { %798 = vadd.xlane.f32.xlu1 %v797_v36  ;;  %v709_v15 = vpop.xlane.xlu1 %708  ;;  %v794_v39 = vsel %vm62_vm0, %v766_v10, 0.0 }
 0x281   :  { %v737_v7 = vmul.f32 0.03125, %v709_v15  ;;  %795 = vadd.xlane.f32.xlu0 %v794_v39  ;;  %v706_v26 = vpop.xlane.xlu0 %705  ;;  %v1788_v39 = vld [vmem:[%s1907_s6] ss:$0 sm:$0xff] }
 0x282   :  { %v736_v37 = vmul.f32 0.03125, %v706_v26 }
 0x283   :  { %v1732_v46 = vsub.f32 %v1639_v53, %v737_v7 }
 0x284   :  { %v1735_v8 = vsub.f32 %v1641_v51, %v736_v37 }
 0x285   :  { %v769_v22 = vmul.f32 %v1732_v46, %v1732_v46 }
 0x286   :  { %v768_v32 = vmul.f32 %v1735_v8, %v1735_v8 }
 0x287   :  { %v803_v25 = vsel %vm62_vm0, %v769_v22, 0.0 }
 0x288   :  { %804 = vadd.xlane.f32.xlu1 %v803_v25  ;;  %v715_v31 = vpop.xlane.xlu1 %714  ;;  %v800_v56 = vsel %vm62_vm0, %v768_v32, 0.0 }
 0x289   :  { %v739_v1 = vmul.f32 0.03125, %v715_v31  ;;  %801 = vadd.xlane.f32.xlu0 %v800_v56  ;;  %v712_v17 = vpop.xlane.xlu0 %711 }
 0x28a   :  { %v738_v53 = vmul.f32 0.03125, %v712_v17 }
 0x28b   :  { %v1744_v44 = vsub.f32 %v1651_v57, %v739_v1 }
 0x28c   :  { %v1747_v51 = vsub.f32 %v1653_v13, %v738_v53 }
 0x28d   :  { %v771_v60 = vmul.f32 %v1744_v44, %v1744_v44 }
 0x28e   :  { %v770_v55 = vmul.f32 %v1747_v51, %v1747_v51 }
 0x28f   :  { %v809_v2 = vsel %vm62_vm0, %v771_v60, 0.0 }
 0x290   :  { %810 = vadd.xlane.f32.xlu1 %v809_v2  ;;  %v721_v42 = vpop.xlane.xlu1 %720  ;;  %v806_v34 = vsel %vm62_vm0, %v770_v55, 0.0 }
 0x291   :  { %v741_v40 = vmul.f32 0.03125, %v721_v42  ;;  %807 = vadd.xlane.f32.xlu0 %v806_v34  ;;  %v718_v33 = vpop.xlane.xlu0 %717 }
 0x292   :  { %v740_v57 = vmul.f32 0.03125, %v718_v33 }
 0x293   :  { %v1756_v19 = vsub.f32 %v1663_v38, %v741_v40 }
 0x294   :  { %v1759_v13 = vsub.f32 %v1665_v35, %v740_v57 }
 0x295   :  { %v773_v58 = vmul.f32 %v1756_v19, %v1756_v19 }
 0x296   :  { %v772_v28 = vmul.f32 %v1759_v13, %v1759_v13 }
 0x297   :  { %v815_v6 = vsel %vm62_vm0, %v773_v58, 0.0 }
 0x298   :  { %816 = vadd.xlane.f32.xlu1 %v815_v6  ;;  %v727_v48 = vpop.xlane.xlu1 %726  ;;  %v812_v27 = vsel %vm62_vm0, %v772_v28, 0.0 }
 0x299   :  { %v743_v63 = vmul.f32 0.03125, %v727_v48  ;;  %813 = vadd.xlane.f32.xlu0 %v812_v27  ;;  %v724_v4 = vpop.xlane.xlu0 %723 }
 0x29a   :  { %v742_v38 = vmul.f32 0.03125, %v724_v4 }
 0x29b   :  { %v1768_v41 = vsub.f32 %v1675_v21, %v743_v63 }
 0x29c   :  { %v1771_v35 = vsub.f32 %v1677_v47, %v742_v38 }
 0x29d   :  { %v775_v20 = vmul.f32 %v1768_v41, %v1768_v41 }
 0x29e   :  { %v774_v5 = vmul.f32 %v1771_v35, %v1771_v35 }
 0x29f   :  { %v821_v3 = vsel %vm62_vm0, %v775_v20, 0.0 }
 0x2a0   :  { %822 = vadd.xlane.f32.xlu1 %v821_v3  ;;  %v818_v45 = vsel %vm62_vm0, %v774_v5, 0.0 }
 0x2a1   :  { %819 = vadd.xlane.f32.xlu0 %v818_v45 }
 0x2f5   :  { %v781_v24 = vpop.xlane.xlu1 %780 }
 0x2f6   :  { %v825_v9 = vmul.f32 0.03125, %v781_v24 }
 0x2f8   :  { %v841_v54 = vadd.f32 1e-05, %v825_v9 }
 0x2f9   :  { %v778_v21 = vpop.xlane.xlu0 %777 }
 0x2fa   :  { %1214 = vrsqrt.f32 %v841_v54  ;;  %v824_v16 = vmul.f32 0.03125, %v778_v21 }
 0x2fc   :  { %v840_v47 = vadd.f32 1e-05, %v824_v16 }
 0x2fd   :  { %v787_v12 = vpop.xlane.xlu1 %786 }
 0x2fe   :  { %1216 = vrsqrt.f32 %v840_v47  ;;  %v827_v30 = vmul.f32 0.03125, %v787_v12 }
 0x300   :  { %v843_v61 = vadd.f32 1e-05, %v827_v30 }
 0x301   :  { %v784_v0 = vpop.xlane.xlu0 %783 }
 0x302   :  { %1218 = vrsqrt.f32 %v843_v61  ;;  %v826_v29 = vmul.f32 0.03125, %v784_v0 }
 0x304   :  { %v1215_v14 = vpop.eup %1214  ;;  %v842_v10 = vadd.f32 1e-05, %v826_v29 }
 0x305   :  { %v873_v36 = vmul.f32 %v1215_v14, %v1684_v50  ;;  %v793_v15 = vpop.xlane.xlu1 %792 }
 0x306   :  { %1220 = vrsqrt.f32 %v842_v10  ;;  %v829_v7 = vmul.f32 0.03125, %v793_v15  ;;  %v790_v26 = vpop.xlane.xlu0 %789 }
 0x307   :  { %v896_v37 = vmul.f32 %v1782_v52, %v873_v36  ;;  %v828_v22 = vmul.f32 0.03125, %v790_v26 }
 0x308   :  { %v1217_v32 = vpop.eup %1216  ;;  %v845_v25 = vadd.f32 1e-05, %v829_v7 }
 0x309   :  { %v919_v31 = vadd.f32 %v1788_v39, %v896_v37  ;;  %v872_v56 = vmul.f32 %v1217_v32, %v1689_v11  ;;  %v844_v1 = vadd.f32 1e-05, %v828_v22 }
 0x30a   :  { %1222 = vrsqrt.f32 %v845_v25 }
 0x30b   :  { %935 = vst.msk [vmem:[%s1908_s7 + $0x8] sm:$0xff] %vm62_vm0, %v919_v31  ;;  %v895_v50 = vmul.f32 %v1782_v52, %v872_v56  ;;  %1224 = vrsqrt.f32 %v844_v1 }
 0x30c   :  { %v1219_v17 = vpop.eup %1218 }
 0x30d   :  { %v918_v53 = vadd.f32 %v1788_v39, %v895_v50  ;;  %v875_v60 = vmul.f32 %v1219_v17, %v1695_v62  ;;  %v799_v55 = vpop.xlane.xlu1 %798 }
 0x30e   :  { %v831_v2 = vmul.f32 0.03125, %v799_v55  ;;  %v796_v42 = vpop.xlane.xlu0 %795 }
 0x30f   :  { %934 = vst.msk [vmem:[%s1908_s7] sm:$0xff] %vm62_vm0, %v918_v53  ;;  %v898_v11 = vmul.f32 %v1782_v52, %v875_v60  ;;  %v830_v34 = vmul.f32 0.03125, %v796_v42 }
 0x310   :  { %v1221_v40 = vpop.eup %1220  ;;  %v847_v33 = vadd.f32 1e-05, %v831_v2 }
 0x311   :  { %v921_v57 = vadd.f32 %v1788_v39, %v898_v11  ;;  %v874_v58 = vmul.f32 %v1221_v40, %v1701_v18  ;;  %v846_v28 = vadd.f32 1e-05, %v830_v34 }
 0x312   :  { %1226 = vrsqrt.f32 %v847_v33 }
 0x313   :  { %937 = vst.msk [vmem:[%s1908_s7 + $0x18] sm:$0xff] %vm62_vm0, %v921_v57  ;;  %v897_v62 = vmul.f32 %v1782_v52, %v874_v58  ;;  %1228 = vrsqrt.f32 %v846_v28 }
 0x314   :  { %v1223_v6 = vpop.eup %1222 }
 0x315   :  { %v1225_v48 = vpop.eup %1224  ;;  %v920_v27 = vadd.f32 %v1788_v39, %v897_v62  ;;  %v877_v63 = vmul.f32 %v1223_v6, %v1707_v23  ;;  %v805_v4 = vpop.xlane.xlu1 %804 }
 0x316   :  { %v876_v38 = vmul.f32 %v1225_v48, %v1711_v49  ;;  %v833_v18 = vmul.f32 0.03125, %v805_v4  ;;  %v802_v20 = vpop.xlane.xlu0 %801 }
 0x317   :  { %936 = vst.msk [vmem:[%s1908_s7 + $0x10] sm:$0xff] %vm62_vm0, %v920_v27  ;;  %v900_v5 = vmul.f32 %v1782_v52, %v877_v63  ;;  %v832_v3 = vmul.f32 0.03125, %v802_v20 }
 0x318   :  { %v899_v45 = vmul.f32 %v1782_v52, %v876_v38  ;;  %v849_v24 = vadd.f32 1e-05, %v833_v18 }
 0x319   :  { %v923_v9 = vadd.f32 %v1788_v39, %v900_v5  ;;  %v848_v54 = vadd.f32 1e-05, %v832_v3 }
 0x31a   :  { %v922_v23 = vadd.f32 %v1788_v39, %v899_v45  ;;  %1230 = vrsqrt.f32 %v849_v24 }
 0x31b   :  { %939 = vst.msk [vmem:[%s1908_s7 + $0x28] sm:$0xff] %vm62_vm0, %v923_v9  ;;  %1232 = vrsqrt.f32 %v848_v54 }
 0x31c   :  { %v1227_v49 = vpop.eup %1226  ;;  %938 = vst.msk [vmem:[%s1908_s7 + $0x20] sm:$0xff] %vm62_vm0, %v922_v23 }
 0x31d   :  { %v1229_v21 = vpop.eup %1228  ;;  %v879_v16 = vmul.f32 %v1227_v49, %v1720_v43  ;;  %v811_v47 = vpop.xlane.xlu1 %810 }
 0x31e   :  { %v878_v12 = vmul.f32 %v1229_v21, %v1723_v59  ;;  %v835_v30 = vmul.f32 0.03125, %v811_v47  ;;  %v808_v61 = vpop.xlane.xlu0 %807 }
 0x31f   :  { %v902_v0 = vmul.f32 %v1782_v52, %v879_v16  ;;  %v834_v29 = vmul.f32 0.03125, %v808_v61 }
 0x320   :  { %v901_v14 = vmul.f32 %v1782_v52, %v878_v12  ;;  %v851_v10 = vadd.f32 1e-05, %v835_v30 }
 0x321   :  { %v925_v36 = vadd.f32 %v1788_v39, %v902_v0  ;;  %v850_v15 = vadd.f32 1e-05, %v834_v29 }
 0x322   :  { %v924_v7 = vadd.f32 %v1788_v39, %v901_v14  ;;  %1234 = vrsqrt.f32 %v851_v10 }
 0x323   :  { %941 = vst.msk [vmem:[%s1908_s7 + $0x38] sm:$0xff] %vm62_vm0, %v925_v36  ;;  %1236 = vrsqrt.f32 %v850_v15 }
 0x324   :  { %v1231_v43 = vpop.eup %1230  ;;  %940 = vst.msk [vmem:[%s1908_s7 + $0x30] sm:$0xff] %vm62_vm0, %v924_v7 }
 0x325   :  { %v1233_v59 = vpop.eup %1232  ;;  %v881_v26 = vmul.f32 %v1231_v43, %v1732_v46  ;;  %v817_v37 = vpop.xlane.xlu1 %816 }
 0x326   :  { %v880_v22 = vmul.f32 %v1233_v59, %v1735_v8  ;;  %v837_v32 = vmul.f32 0.03125, %v817_v37  ;;  %v814_v25 = vpop.xlane.xlu0 %813 }
 0x327   :  { %v904_v31 = vmul.f32 %v1782_v52, %v881_v26  ;;  %v836_v56 = vmul.f32 0.03125, %v814_v25 }
 0x328   :  { %v903_v1 = vmul.f32 %v1782_v52, %v880_v22  ;;  %v853_v50 = vadd.f32 1e-05, %v837_v32 }
 0x329   :  { %v927_v17 = vadd.f32 %v1788_v39, %v904_v31  ;;  %v852_v53 = vadd.f32 1e-05, %v836_v56 }
 0x32a   :  { %v926_v60 = vadd.f32 %v1788_v39, %v903_v1  ;;  %1238 = vrsqrt.f32 %v853_v50 }
 0x32b   :  { %943 = vst.msk [vmem:[%s1908_s7 + $0x48] sm:$0xff] %vm62_vm0, %v927_v17  ;;  %1240 = vrsqrt.f32 %v852_v53 }
 0x32c   :  { %v1235_v46 = vpop.eup %1234  ;;  %942 = vst.msk [vmem:[%s1908_s7 + $0x40] sm:$0xff] %vm62_vm0, %v926_v60 }
 0x32d   :  { %v1237_v8 = vpop.eup %1236  ;;  %v883_v55 = vmul.f32 %v1235_v46, %v1744_v44  ;;  %v823_v2 = vpop.xlane.xlu1 %822 }
 0x32e   :  { %v882_v42 = vmul.f32 %v1237_v8, %v1747_v51  ;;  %v839_v11 = vmul.f32 0.03125, %v823_v2  ;;  %v820_v34 = vpop.xlane.xlu0 %819 }
 0x32f   :  { %v906_v40 = vmul.f32 %v1782_v52, %v883_v55  ;;  %v838_v33 = vmul.f32 0.03125, %v820_v34 }
 0x330   :  { %v905_v57 = vmul.f32 %v1782_v52, %v882_v42  ;;  %v855_v58 = vadd.f32 1e-05, %v839_v11 }
 0x331   :  { %v929_v28 = vadd.f32 %v1788_v39, %v906_v40  ;;  %v854_v62 = vadd.f32 1e-05, %v838_v33 }
 0x332   :  { %v928_v6 = vadd.f32 %v1788_v39, %v905_v57  ;;  %1242 = vrsqrt.f32 %v855_v58 }
 0x333   :  { %945 = vst.msk [vmem:[%s1908_s7 + $0x58] sm:$0xff] %vm62_vm0, %v929_v28  ;;  %1244 = vrsqrt.f32 %v854_v62 }
 0x334   :  { %v1239_v44 = vpop.eup %1238  ;;  %944 = vst.msk [vmem:[%s1908_s7 + $0x50] sm:$0xff] %vm62_vm0, %v928_v6 }
 0x335   :  { %v1241_v51 = vpop.eup %1240  ;;  %v885_v48 = vmul.f32 %v1239_v44, %v1756_v19 }
 0x336   :  { %v884_v27 = vmul.f32 %v1241_v51, %v1759_v13 }
 0x337   :  { %v908_v63 = vmul.f32 %v1782_v52, %v885_v48 }
 0x338   :  { %v907_v4 = vmul.f32 %v1782_v52, %v884_v27 }
 0x339   :  { %v931_v38 = vadd.f32 %v1788_v39, %v908_v63 }
 0x33a   :  { %v930_v18 = vadd.f32 %v1788_v39, %v907_v4 }
 0x33b   :  { %947 = vst.msk [vmem:[%s1908_s7 + $0x68] sm:$0xff] %vm62_vm0, %v931_v38 }
 0x33c   :  { %v1243_v20 = vpop.eup %1242  ;;  %946 = vst.msk [vmem:[%s1908_s7 + $0x60] sm:$0xff] %vm62_vm0, %v930_v18 }
 0x33d   :  { %v1245_v19 = vpop.eup %1244  ;;  %v887_v13 = vmul.f32 %v1243_v20, %v1768_v41 }
 0x33e   :  { %v886_v5 = vmul.f32 %v1245_v19, %v1771_v35 }
 0x33f   :  { %v910_v3 = vmul.f32 %v1782_v52, %v887_v13 }
 0x340   :  { %v909_v45 = vmul.f32 %v1782_v52, %v886_v5 }
 0x341   :  { %v933_v24 = vadd.f32 %v1788_v39, %v910_v3 }
 0x342   :  { %v932_v9 = vadd.f32 %v1788_v39, %v909_v45 }
 0x343   :  { %949 = vst.msk [vmem:[%s1908_s7 + $0x78] sm:$0xff] %vm62_vm0, %v933_v24 }
 0x344   :  { %948 = vst.msk [vmem:[%s1908_s7 + $0x70] sm:$0xff] %vm62_vm0, %v932_v9 }

</bundles_post_ra>
